<compile_context>
chip_gen: v7x
topology: tpu7x:2x2x1
jax: 0.10.0
libtpu: 0.0.40
codegen_flags: <defaults>
</compile_context>

<pallas_src>
import jax
import jax.numpy as jnp
from jax import lax
from jax.experimental import pallas as pl
from jax.experimental.pallas import tpu as pltpu

_COLS = 512                    # lane-dense last dim (multiple of 128)
_MAX_BLOCK_ROWS = 2048         # 2048 x 512 x 4 B = 4 MiB per buffer per slot
_VMEM_LIMIT_BYTES = 48 << 20   # < v7x's 64 MiB physical VMEM, > v5e's 16 MiB default


def _relu_kernel(x_ref, o_ref):
    # Elementwise max on the VPU; the kernel is HBM-bandwidth bound, so no
    # further in-kernel compute tuning is useful.
    o_ref[...] = jnp.maximum(x_ref[...], 0.0)


def _round_up(n: int, m: int) -> int:
    return ((n + m - 1) // m) * m


def _complex_relu_impl(x: jax.Array) -> jax.Array:
    assert jnp.issubdtype(x.dtype, jnp.complexfloating), "expects complex input"
    orig_shape = x.shape
    n_complex = 1
    for d in orig_shape:
        n_complex *= d
    n_f32 = 2 * n_complex

    # ---- XLA glue (fuses into one pass under jit): planes -> flat -> pad. ----
    planes = jnp.stack([jnp.real(x), jnp.imag(x)], axis=0)   # (2, *orig) float32
    flat = planes.reshape(n_f32)

    rows = _round_up(pl.cdiv(n_f32, _COLS), 8)               # full-sublane rows
    padded_len = rows * _COLS
    if padded_len != n_f32:
        flat = jnp.pad(flat, (0, padded_len - n_f32))        # zeros pass relu unchanged
    tiled = flat.reshape(rows, _COLS)

    # ---- Block sizing: ~4 MiB tiles, >= 2 grid steps when possible (v7x). ----
    n_steps = max(1, pl.cdiv(rows, _MAX_BLOCK_ROWS))
    if rows >= 16:
        n_steps = max(n_steps, 2)                            # keep both v7x TCs busy
    block_rows = _round_up(pl.cdiv(rows, n_steps), 8)        # multiple of 8, <= 2048
    grid = (pl.cdiv(rows, block_rows),)

    spec = pl.BlockSpec((block_rows, _COLS), lambda t: (t, 0))

    out = pl.pallas_call(
        _relu_kernel,
        out_shape=jax.ShapeDtypeStruct((rows, _COLS), jnp.float32),
        grid=grid,
        in_specs=[spec],
        out_specs=spec,
        input_output_aliases={0: 0},     # donate the temporary float32 slab
        compiler_params=pltpu.CompilerParams(
            dimension_semantics=("parallel",),
            vmem_limit_bytes=_VMEM_LIMIT_BYTES,
        ),
    )(tiled)

    # ---- XLA glue (one fused pass): un-pad, split planes, recombine. ----
    planes_out = out.reshape(padded_len)[:n_f32].reshape((2,) + orig_shape)
    return lax.complex(planes_out[0], planes_out[1])


# jit so the pre/post glue each fuse into a single HBM pass and the
# input_output_aliases donation is honored without copies/warnings.
complex_relu = jax.jit(_complex_relu_impl)


def _reference(real: jax.Array, imag: jax.Array) -> jax.Array:
    return lax.complex(jnp.maximum(real, 0.0), jnp.maximum(imag, 0.0))


if __name__ == "__main__":
    key = jax.random.PRNGKey(0)
    k1, k2 = jax.random.split(key)
    B, S, H = 2, 8, 32
    real = jax.random.normal(k1, (B, S, H), dtype=jnp.float32)
    imag = jax.random.normal(k2, (B, S, H), dtype=jnp.float32)
    x = lax.complex(real, imag)  # complex64, shape (2, 8, 32)

    out = jax.block_until_ready(complex_relu(x))

    ref = _reference(real, imag)
    assert out.dtype == jnp.complex64
    assert out.shape == x.shape
    assert jnp.allclose(jnp.real(out), jnp.real(ref), atol=1e-6)
    assert jnp.allclose(jnp.imag(out), jnp.imag(ref), atol=1e-6)

    print("KERNEL_OK")
</pallas_src>

<mosaic_0001>
module attributes {stable_mosaic.version = 11 : i64} {
  func.func @_relu_kernel(%arg0: i32, %arg1: memref<8x512xf32, #tpu.memory_space<vmem>>, %arg2: memref<8x512xf32, #tpu.memory_space<vmem>>) attributes {dimension_semantics = [#tpu.dimension_semantics<parallel>], iteration_bounds = array<i64: 1>, scalar_prefetch = 0 : i64, scratch_operands = 0 : i64, tpu.core_type = #tpu.core_type<tc>, window_params = [{transform_indices = @transform_0, window_bounds = array<i64: 8, 512>}, {transform_indices = @transform_1, window_bounds = array<i64: 8, 512>}]} {
    %c0 = arith.constant 0 : index
    %c0_0 = arith.constant 0 : index
    %0 = vector.load %arg1[%c0, %c0_0] : memref<8x512xf32, #tpu.memory_space<vmem>>, vector<8x512xf32>
    %cst = arith.constant 0.000000e+00 : f32
    %1 = vector.broadcast %cst : f32 to vector<8x512xf32>
    %2 = arith.maximumf %0, %1 : vector<8x512xf32>
    %c0_1 = arith.constant 0 : index
    %c0_2 = arith.constant 0 : index
    %3 = vector.load %arg2[%c0_1, %c0_2] : memref<8x512xf32, #tpu.memory_space<vmem>>, vector<8x512xf32>
    tpu.vector_store %arg2[%c0_1, %c0_2], %2 {strides = array<i32>} : memref<8x512xf32, #tpu.memory_space<vmem>>, vector<8x512xf32>,
    return
  }
  func.func @transform_0(%arg0: i32) -> (i32, i32) {
    %c0_i32 = arith.constant 0 : i32
    %c0_i32_0 = arith.constant 0 : i32
    return %arg0, %c0_i32 : i32, i32
  }
  func.func @transform_1(%arg0: i32) -> (i32, i32) {
    %c0_i32 = arith.constant 0 : i32
    %c0_i32_0 = arith.constant 0 : i32
    return %arg0, %c0_i32 : i32, i32
  }
}

</mosaic_0001>

<bundles_post_ra>
// kernel: custom-call.1
= control target key start
LH: loop header
LB: loop body
LE: loop exit
PB: predicated region body
PF: predicated region fallthrough
CT: control target
= control target key end

     0   :  { %s59_s0 = inlined_call_operand.hbm [shape: c64[2,8,32], index: 0, kind: input, shape index: {}]   ;;  %s60_s1 = inlined_call_operand.vmem [shape: f32[2,8,32], index: 1, kind: output, shape index: {}]  }
   0x1   :  { %s2_s8 = scalar_lea.hbm %s59_s0, 256 }
   0x2   :  { %3 = vsyncpa [#allocation0], 0  ;;  %s4_s11 = sshll.u32 %s60_s1, 4  ;;  %s34_s14 = scalar_lea.hbm %s59_s0, 512  ;;  %s5_s11 = int_to_ptr.vmem [resolvable:$true] %s4_s11 }
   0x3   :  { %p11_p0 = scmp.ne.s32.totalorder %s2_s8, %s34_s14  ;;  %p13_p1 = scmp.lt.u32.totalorder %s2_s8, %s59_s0 }
   0x4   :  { %p14_p2 = scmp.lt.u32.totalorder %s34_s14, %s34_s14  ;;  %p16_p4 = scmp.lt.u32.totalorder %s34_s14, %s2_s8 }
   0x6   :  { %p15_p3 = por %p14_p2, %p13_p1 }
   0x8   :  { %p17_p5 = por %p16_p4, %p15_p3 }
   0xa   :  { %p18_p6 = pnand %p17_p5, %p11_p0 }
   0xc   :  { %21 = shalt.err (!%p18_p6)  }
   0xd   :  { %s22_s17 = scalar_lea.vmem %s5_s11, 256  ;;  %p27_p8 = scmp.lt.s32.totalorder %s5_s11, %s5_s11 }
   0xe   :  { %p23_p7 = scmp.ne.s32.totalorder %s5_s11, %s22_s17  ;;  %p28_p9 = scmp.lt.s32.totalorder %s22_s17, %s22_s17 }
  0x10   :  { %p29_p10 = por %p28_p9, %p27_p8 }
  0x12   :  { %p30_p11 = pnand %p29_p10, %p23_p7 }
  0x14   :  { %33 = shalt.err (!%p30_p11)  }
  0x15   :  { %7 = dma.hbm_to_vmem [thread:$0]  %s2_s8, 256, %s5_s11, [#allocation0] }
  0x16   :  { %35 = dma.done.wait [#allocation0], 256  }
  0x17   :  { %36 = vsyncadd [#allocation0], 4294967040 }
  0x18   :  { %9 = vsyncpa [#allocation0], 1 }

// kernel: custom-call
= control target key start
LH: loop header
LB: loop body
LE: loop exit
PB: predicated region body
PF: predicated region fallthrough
CT: control target
= control target key end

     0   :  { %2 = vsyncpa [#allocation0], 0  ;;  %s61_s0 = inlined_call_operand.hbm [shape: c64[2,8,32], index: 0, kind: input, shape index: {}]   ;;  %s62_s1 = inlined_call_operand.vmem [shape: f32[2,8,32], index: 1, kind: output, shape index: {}]  }
   0x1   :  { %s3_s8 = sshll.u32 %s62_s1, 4  ;;  %s9_s11 = scalar_lea.hbm %s61_s0, 256  ;;  %s4_s8 = int_to_ptr.vmem [resolvable:$true] %s3_s8 }
   0x2   :  { %p10_p0 = scmp.ne.s32.totalorder %s61_s0, %s9_s11  ;;  %s11_s16 = scalar_lea.hbm %s61_s0, 512 }
   0x3   :  { %p12_p1 = scmp.lt.u32.totalorder %s11_s16, %s9_s11  ;;  %p13_p2 = scmp.lt.u32.totalorder %s9_s11, %s61_s0 }
   0x5   :  { %p14_p3 = por %p13_p2, %p12_p1 }
   0x7   :  { %p15_p4 = pnand %p14_p3, %p10_p0 }
   0x9   :  { %18 = shalt.err (!%p15_p4)  }
   0xa   :  { %s19_s1 = scalar_lea.vmem %s4_s8, 256  ;;  %p24_p6 = scmp.lt.s32.totalorder %s4_s8, %s4_s8 }
   0xb   :  { %p20_p5 = scmp.ne.s32.totalorder %s4_s8, %s19_s1  ;;  %p25_p7 = scmp.lt.s32.totalorder %s19_s1, %s19_s1 }
   0xd   :  { %p26_p8 = por %p25_p7, %p24_p6 }
   0xf   :  { %p27_p9 = pnand %p26_p8, %p20_p5 }
  0x11   :  { %30 = shalt.err (!%p27_p9)  }
  0x12   :  { %6 = dma.hbm_to_vmem [thread:$0]  %s61_s0, 256, %s4_s8, [#allocation0] }
  0x13   :  { %31 = dma.done.wait [#allocation0], 256  }
  0x14   :  { %32 = vsyncadd [#allocation0], 4294967040 }
  0x15   :  { %8 = vsyncpa [#allocation0], 1 }

// kernel: squeeze.2
= control target key start
LH: loop header
LB: loop body
LE: loop exit
PB: predicated region body
PF: predicated region fallthrough
CT: control target
= control target key end

     0   :  { %s34_s8 = smov 32   ;;  %vm7_vm0 = vcmask 261120   ;;  %s35_s11 = smov 64   ;;  %s61_s0 = inlined_call_operand.vmem [shape: f32[512], index: 0, kind: input, shape index: {}]   ;;  %s62_s1 = inlined_call_operand.vmem [shape: f32[2,8,32], index: 1, kind: output, shape index: {}]  }
   0x1   :  { %v4_v0 = vld [vmem:[%s61_s0] sm:$0xf]  ;;  %s33_s0 = smov 96  }
   0x2   :  { %5 = vst [vmem:[#allocation0] sm:$0xf] %v4_v0 }
   0x9   :  { %v9_v1 = vld [vmem:[#allocation0] sm:$0xf]  }
   0xa   :  { %v21_v2 = vld [vmem:[#allocation0] sm:$0xf]   ;;  %10 = vrot.lane.b32.xlu0 %v9_v1, %s33_s0 }
   0xb   :  { %22 = vrot.lane.b32.xlu1 %v21_v2, %s34_s8  ;;  %v6_v3 = vld [vmem:[#allocation0] sm:$0xf]  }
   0xc   :  { %v15_v4 = vld [vmem:[#allocation0] sm:$0xf]   ;;  %8 = vst.msk [vmem:[%s62_s1] ss:$4 sm:$0xf] %vm7_vm0, %v6_v3  }
   0xe   :  { %16 = vrot.lane.b32.xlu0 %v15_v4, %s35_s11 }
  0x7c   :  { %v11_v5 = vpop.permute.xlu0 %10  }
  0x7d   :  { %v23_v6 = vpop.permute.xlu1 %22   ;;  %27 = vst.msk [vmem:[%s62_s1 + $0x1] ss:$4 sm:$0xf] %vm7_vm0, %v11_v5  }
  0x7e   :  { %29 = vst.msk [vmem:[%s62_s1 + $0x3] ss:$4 sm:$0xf] %vm7_vm0, %v23_v6  }
  0x80   :  { %v17_v7 = vpop.permute.xlu0 %16  }
  0x81   :  { %28 = vst.msk [vmem:[%s62_s1 + $0x2] ss:$4 sm:$0xf] %vm7_vm0, %v17_v7  }

// kernel: custom-call.2
= control target key start
LH: loop header
LB: loop body
LE: loop exit
PB: predicated region body
PF: predicated region fallthrough
CT: control target
= control target key end

     0   :  { %s126_s0 = inlined_call_operand.vmem [shape: f32[2,8,32], index: 0, kind: input, shape index: {}]   ;;  %s127_s1 = inlined_call_operand.vmem [shape: f32[2,8,32], index: 1, kind: input, shape index: {}]   ;;  %s128_s2 = inlined_call_operand.hbm [shape: c64[2,8,32], index: 2, kind: output, shape index: {}]  }
   0x1   :  { %s87_s11 = scalar_lea.hbm %s128_s2, 256 }
   0x2   :  { %4 = vsyncpa [#allocation0], 0  ;;  %s5_s14 = sshll.u32 %s126_s0, 4  ;;  %s6_s14 = int_to_ptr.vmem [resolvable:$true] %s5_s14 }
   0x3   :  { %s18_s15 = scalar_lea.vmem %s6_s14, 256  ;;  %p23_p1 = scmp.lt.s32.totalorder %s6_s14, %s6_s14 }
   0x4   :  { %p19_p0 = scmp.ne.s32.totalorder %s6_s14, %s18_s15  ;;  %p24_p2 = scmp.lt.s32.totalorder %s18_s15, %s18_s15 }
   0x6   :  { %p25_p3 = por %p24_p2, %p23_p1 }
   0x8   :  { %p26_p4 = pnand %p25_p3, %p19_p0 }
   0xa   :  { %29 = shalt.err (!%p26_p4)  }
   0xb   :  { %p31_p5 = scmp.ne.s32.totalorder %s128_s2, %s87_s11  ;;  %s32_s0 = scalar_lea.hbm %s128_s2, 512 }
   0xc   :  { %p33_p6 = scmp.lt.u32.totalorder %s32_s0, %s87_s11  ;;  %p34_p7 = scmp.lt.u32.totalorder %s87_s11, %s128_s2 }
   0xe   :  { %p35_p8 = por %p34_p7, %p33_p6 }
  0x10   :  { %p36_p9 = pnand %p35_p8, %p31_p5 }
  0x12   :  { %39 = shalt.err (!%p36_p9)  }
  0x13   :  { %8 = dma.vmem_to_hbm [thread:$0]  %s6_s14, 256, %s128_s2, [#allocation0] }
  0x14   :  { %65 = dma.done.wait [#allocation0], 256  }
  0x15   :  { %66 = vsyncadd [#allocation0], 4294967040 }
  0x16   :  { %10 = vsyncpa [#allocation0], 1 }
  0x17   :  { %11 = vsyncpa [#allocation1], 0  ;;  %s12_s28 = sshll.u32 %s127_s1, 4  ;;  %s13_s28 = int_to_ptr.vmem [resolvable:$true] %s12_s28 }
  0x18   :  { %s40_s29 = scalar_lea.vmem %s13_s28, 256  ;;  %p45_p11 = scmp.lt.s32.totalorder %s13_s28, %s13_s28 }
  0x19   :  { %p41_p10 = scmp.ne.s32.totalorder %s13_s28, %s40_s29  ;;  %p46_p12 = scmp.lt.s32.totalorder %s40_s29, %s40_s29 }
  0x1b   :  { %p47_p13 = por %p46_p12, %p45_p11 }
  0x1d   :  { %p48_p0 = pnand %p47_p13, %p41_p10 }
  0x1f   :  { %51 = shalt.err (!%p48_p0)  }
  0x20   :  { %p53_p1 = scmp.ne.s32.totalorder %s87_s11, %s32_s0  ;;  %p56_p2 = scmp.lt.u32.totalorder %s32_s0, %s32_s0 }
  0x22   :  { %p57_p3 = por %p56_p2, %p34_p7 }
  0x24   :  { %p59_p4 = por %p57_p3, %p33_p6 }
  0x26   :  { %p60_p5 = pnand %p59_p4, %p53_p1 }
  0x28   :  { %63 = shalt.err (!%p60_p5)  }
  0x29   :  { %15 = dma.vmem_to_hbm [thread:$0]  %s13_s28, 256, %s87_s11, [#allocation1] }
  0x2a   :  { %67 = dma.done.wait [#allocation1], 256  }
  0x2b   :  { %68 = vsyncadd [#allocation1], 4294967040 }
  0x2c   :  { %17 = vsyncpa [#allocation1], 1 }

// kernel: _complex_relu_impl.1
= control target key start
LH: loop header
LB: loop body
LE: loop exit
PB: predicated region body
PF: predicated region fallthrough
CT: control target
= control target key end

     0   :  { %s58_s0 = inlined_call_operand.vmem [shape: f32[8,512], index: 0, kind: input, shape index: {}, may-alias: {0,1}]   ;;  %s59_s1 = inlined_call_operand.vmem [shape: f32[8,512], index: 1, kind: output, shape index: {}, may-alias: {0,1}]  }
   0x1   :  { %v8_v0 = vld [vmem:[%s58_s0] sm:$0xff]  ;;  %v9_v1 = vld [vmem:[%s58_s0 + $0x8] sm:$0xff]  ;;  %v10_v2 = vld [vmem:[%s58_s0 + $0x10] sm:$0xff] }
   0x2   :  { %v12_v3 = vmax.f32 %v8_v0, 0.0  ;;  %v13_v4 = vmax.f32 %v9_v1, 0.0  ;;  %v14_v5 = vmax.f32 %v10_v2, 0.0  ;;  %v11_v6 = vld [vmem:[%s58_s0 + $0x18] sm:$0xff] }
   0x3   :  { %v15_v7 = vmax.f32 %v11_v6, 0.0 }
   0x4   :  { %16 = vst [vmem:[%s59_s1] sm:$0xff] %v12_v3  ;;  %17 = vst [vmem:[%s59_s1 + $0x8] sm:$0xff] %v13_v4 }
   0x5   :  { %18 = vst [vmem:[%s59_s1 + $0x10] sm:$0xff] %v14_v5  ;;  %19 = vst [vmem:[%s59_s1 + $0x18] sm:$0xff] %v15_v7 }

</bundles_post_ra>
